<compile_context>
chip_gen: v7x
topology: tpu7x:2x2x1
jax: 0.10.0
libtpu: 0.0.40
codegen_flags: <defaults>
</compile_context>

<pallas_src>
import functools

import jax
import jax.numpy as jnp
from jax.experimental import pallas as pl
from jax.experimental.pallas import tpu as pltpu

BN_EPS = 1e-5


# ----------------------------------------------------------------------------
# Pallas kernel: one fully fused ASPP stage.
#
#   H   = relu(W_all @ X_all + b_all)    # 4 branches (+folded BN) in one matmul
#   out = relu(W5   @ H     + b5)        # final 1x1 conv (+folded BN)
#
# Transposed ("channels in sublanes, pixels in lanes") orientation:
#   X_all : [K, M]      K = 27*Cin (zero-padded to a multiple of 8), M = N*H*W
#   W_all : [4*mid, K]  block-structured, BN scale pre-folded
#   out   : [Cout, M]   lane-dense (M is a multiple of 128 at these shapes)
# ----------------------------------------------------------------------------
def _aspp_fused_kernel(x_ref, w_ref, b_ref, w5_ref, b5_ref, o_ref):
    h = jnp.dot(w_ref[...], x_ref[...], preferred_element_type=jnp.float32)
    h = jnp.maximum(h + b_ref[...], 0.0)                 # branches + BN + ReLU
    acc = jnp.dot(w5_ref[...], h.astype(w5_ref.dtype),
                  preferred_element_type=jnp.float32)    # final 1x1 over concat
    o_ref[...] = jnp.maximum(acc + b5_ref[...], 0.0).astype(o_ref.dtype)


def _pick_tm(m):
    # Largest lane-dense tile (multiple of 128) dividing m; a single block at
    # toy sizes (per review).  Falls back to full extent if m % 128 != 0.
    for tm in (2048, 1024, 512, 256, 128):
        if m % tm == 0:
            return tm
    return m


def fused_aspp_matmul(x_all, w_all, b_all, w5, b5):
    """x_all:[K,M] bf16, w_all:[R,K] bf16, b_all:[R,1] f32, w5:[Cout,R] bf16,
    b5:[Cout,1] f32  ->  [Cout, M] f32."""
    k, m = x_all.shape
    r = w_all.shape[0]
    cout = w5.shape[0]
    tm = _pick_tm(m)
    grid = (m // tm,)
    return pl.pallas_call(
        _aspp_fused_kernel,
        out_shape=jax.ShapeDtypeStruct((cout, m), jnp.float32),
        grid_spec=pltpu.PrefetchScalarGridSpec(
            num_scalar_prefetch=0,
            grid=grid,
            in_specs=[
                pl.BlockSpec((k, tm), lambda i: (0, i)),      # activations
                pl.BlockSpec((r, k), lambda i: (0, 0)),       # packed W_all
                pl.BlockSpec((r, 1), lambda i: (0, 0)),       # folded biases
                pl.BlockSpec((cout, r), lambda i: (0, 0)),    # W5 (scale folded)
                pl.BlockSpec((cout, 1), lambda i: (0, 0)),    # folded bias5
            ],
            out_specs=pl.BlockSpec((cout, tm), lambda i: (0, i)),
        ),
        compiler_params=pltpu.CompilerParams(
            dimension_semantics=("parallel",),
            vmem_limit_bytes=32 * 1024 * 1024,
        ),
    )(x_all, w_all, b_all, w5, b5)


# ----------------------------------------------------------------------------
# XLA glue (fused by XLA; not worth separate kernel launches at these sizes)
# ----------------------------------------------------------------------------
def maxpool2x2_cnhw(x):
    """MaxPool2d(2) on a [C, N, H, W] tensor (floors odd H/W like PyTorch)."""
    c, n, h, w = x.shape
    h2, w2 = h // 2, w // 2
    x = x[:, :, :h2 * 2, :w2 * 2]
    x = x.reshape(c, n, h2, 2, w2, 2)
    return jnp.max(x, axis=(3, 5))


def _dilated_taps(x_cnhw, d):
    """3x3 dilated-conv taps of a [C,N,H,W] tensor -> [9*C, N*H*W] (tap-major,
    channel-minor rows; 'same' padding = d like the PyTorch convs)."""
    c, n, h, w = x_cnhw.shape
    xp = jnp.pad(x_cnhw, ((0, 0), (0, 0), (d, d), (d, d)))
    taps = [xp[:, :, ky * d:ky * d + h, kx * d:kx * d + w]
            for ky in range(3) for kx in range(3)]
    return jnp.stack(taps, axis=0).reshape(9 * c, n * h * w)


# ----------------------------------------------------------------------------
# Trace-time parameter packing (BN folding, branch packing) — constant-folded
# ----------------------------------------------------------------------------
def pack_aspp_params(p, cin):
    mid = p["w1"].shape[0]
    cout = p["w5"].shape[0]

    def scale_of(bn):
        return bn["gamma"] * jax.lax.rsqrt(bn["var"] + BN_EPS)

    def bias_of(conv_b, bn, s):
        return (conv_b - bn["mean"]) * s + bn["beta"]

    s1, s2, s3, s4, s5 = (scale_of(p[f"bn{i}"]) for i in range(1, 6))

    def w3x3m(w, s):
        # OIHW -> [mid, 9*cin] with column order (ky, kx, ci); BN scale folded.
        return (jnp.transpose(w, (0, 2, 3, 1)).reshape(w.shape[0], 9 * cin)
                * s[:, None])

    w1m = p["w1"].reshape(mid, cin) * s1[:, None]
    w2m = w3x3m(p["w2"], s2)
    w3m = w3x3m(p["w3"], s3)
    w4m = w3x3m(p["w4"], s4)

    k = 27 * cin
    kp = -(-k // 8) * 8                      # round K up to a multiple of 8
    w_all = jnp.zeros((4 * mid, kp), jnp.float32)
    # X_all row blocks: [d=2 taps | d=5 taps | d=1 taps]
    c1x1 = 18 * cin + 4 * cin                # centre tap of the d=1 block == x
    w_all = w_all.at[0:mid, c1x1:c1x1 + cin].set(w1m)          # 1x1 branch
    w_all = w_all.at[mid:2 * mid, 0:9 * cin].set(w2m)          # 3x3, d=2
    w_all = w_all.at[2 * mid:3 * mid, 9 * cin:18 * cin].set(w3m)   # 3x3, d=5
    w_all = w_all.at[3 * mid:4 * mid, 18 * cin:27 * cin].set(w4m)  # 3x3, d=1

    b_all = jnp.concatenate([bias_of(p["b1"], p["bn1"], s1),
                             bias_of(p["b2"], p["bn2"], s2),
                             bias_of(p["b3"], p["bn3"], s3),
                             bias_of(p["b4"], p["bn4"], s4)])[:, None]

    w5m = p["w5"].reshape(cout, 4 * mid) * s5[:, None]
    b5m = bias_of(p["b5"], p["bn5"], s5)[:, None]
    return (w_all.astype(jnp.bfloat16), b_all.astype(jnp.float32),
            w5m.astype(jnp.bfloat16), b5m.astype(jnp.float32))


# ----------------------------------------------------------------------------
# Forward
# ----------------------------------------------------------------------------
def aspp_stage(x_cnhw, packed):
    c, n, h, w = x_cnhw.shape
    w_all, b_all, w5m, b5m = packed
    x_all = jnp.concatenate([_dilated_taps(x_cnhw, 2),
                             _dilated_taps(x_cnhw, 5),
                             _dilated_taps(x_cnhw, 1)], axis=0)
    kp = w_all.shape[1]
    if kp > x_all.shape[0]:                  # zero rows match zero weight cols
        x_all = jnp.pad(x_all, ((0, kp - x_all.shape[0]), (0, 0)))
    out = fused_aspp_matmul(x_all.astype(jnp.bfloat16),
                            w_all, b_all, w5m, b5m)
    cout = w5m.shape[0]
    return out.reshape(cout, n, h, w)


def double_aspp_forward(x_nchw, params1, params2):
    cin = x_nchw.shape[1]
    mid1 = params1["w5"].shape[0]            # channels entering stage 2
    packed1 = pack_aspp_params(params1, cin)
    packed2 = pack_aspp_params(params2, mid1)
    x = jnp.transpose(x_nchw, (1, 0, 2, 3))  # NCHW -> CNHW (pixels -> lanes)
    x = maxpool2x2_cnhw(x)
    x = aspp_stage(x, packed1)
    x = aspp_stage(x, packed2)
    return jnp.transpose(x, (1, 0, 2, 3))    # CNHW -> NCHW


# ----------------------------------------------------------------------------
# Deterministic parameter construction (synthetic, matches nn.Module shapes)
# ----------------------------------------------------------------------------
def _bn_params(key, c):
    k1, k2, k3 = jax.random.split(key, 3)
    return dict(
        gamma=1.0 + 0.1 * jax.random.normal(k1, (c,), jnp.float32),
        beta=0.1 * jax.random.normal(k2, (c,), jnp.float32),
        mean=0.1 * jax.random.normal(k3, (c,), jnp.float32),
        var=jnp.ones((c,), jnp.float32),
    )


def init_aspp_params(key, cin, cout):
    mid = cout // 2
    ks = jax.random.split(key, 15)

    def cw(k, co, ci, kh, kw):
        return 0.1 * jax.random.normal(k, (co, ci, kh, kw), jnp.float32)

    def cb(k, co):
        return 0.05 * jax.random.normal(k, (co,), jnp.float32)

    return dict(
        w1=cw(ks[0], mid, cin, 1, 1), b1=cb(ks[1], mid), bn1=_bn_params(ks[2], mid),
        w2=cw(ks[3], mid, cin, 3, 3), b2=cb(ks[4], mid), bn2=_bn_params(ks[5], mid),
        w3=cw(ks[6], mid, cin, 3, 3), b3=cb(ks[7], mid), bn3=_bn_params(ks[8], mid),
        w4=cw(ks[9], mid, cin, 3, 3), b4=cb(ks[10], mid), bn4=_bn_params(ks[11], mid),
        w5=cw(ks[12], cout, 4 * mid, 1, 1), b5=cb(ks[13], cout),
        bn5=_bn_params(ks[14], cout),
    )


# ----------------------------------------------------------------------------
if __name__ == "__main__":
    in_channels, out_channels = 4, 8
    N, H, W = 2, 16, 16

    key = jax.random.PRNGKey(0)
    kx, k1, k2 = jax.random.split(key, 3)
    x = jax.random.normal(kx, (N, in_channels, H, W), jnp.float32)

    params1 = init_aspp_params(k1, in_channels, out_channels)
    params2 = init_aspp_params(k2, out_channels, out_channels)

    fwd = jax.jit(functools.partial(double_aspp_forward,
                                    params1=params1, params2=params2))
    out = fwd(x)
    out = jax.block_until_ready(out)

    expected_shape = (N, out_channels, H // 2, W // 2)
    assert out.shape == expected_shape, (out.shape, expected_shape)
    assert bool(jnp.all(jnp.isfinite(out)))
    print("KERNEL_OK")
</pallas_src>

<mosaic_0001>
module attributes {stable_mosaic.version = 11 : i64} {
  func.func @_aspp_fused_kernel(%arg0: i32, %arg1: memref<112x128xbf16, #tpu.memory_space<vmem>>, %arg2: memref<16x112xbf16, #tpu.memory_space<vmem>>, %arg3: memref<16x1xf32, #tpu.memory_space<vmem>>, %arg4: memref<8x16xbf16, #tpu.memory_space<vmem>>, %arg5: memref<8x1xf32, #tpu.memory_space<vmem>>, %arg6: memref<8x128xf32, #tpu.memory_space<vmem>>) attributes {dimension_semantics = [#tpu.dimension_semantics<parallel>], iteration_bounds = array<i64: 1>, scalar_prefetch = 0 : i64, scratch_operands = 0 : i64, tpu.core_type = #tpu.core_type<tc>, window_params = [{transform_indices = @transform_0, window_bounds = array<i64: 112, 128>}, {pipeline_mode = #tpu.pipeline_mode<synchronous>, transform_indices = @transform_1, window_bounds = array<i64: 16, 112>}, {pipeline_mode = #tpu.pipeline_mode<synchronous>, transform_indices = @transform_2, window_bounds = array<i64: 16, 1>}, {pipeline_mode = #tpu.pipeline_mode<synchronous>, transform_indices = @transform_3, window_bounds = array<i64: 8, 16>}, {pipeline_mode = #tpu.pipeline_mode<synchronous>, transform_indices = @transform_4, window_bounds = array<i64: 8, 1>}, {transform_indices = @transform_5, window_bounds = array<i64: 8, 128>}]} {
    %c0 = arith.constant 0 : index
    %c0_0 = arith.constant 0 : index
    %0 = vector.load %arg2[%c0, %c0_0] : memref<16x112xbf16, #tpu.memory_space<vmem>>, vector<16x112xbf16>
    %c0_1 = arith.constant 0 : index
    %c0_2 = arith.constant 0 : index
    %1 = vector.load %arg1[%c0_1, %c0_2] : memref<112x128xbf16, #tpu.memory_space<vmem>>, vector<112x128xbf16>
    %cst = arith.constant dense<0.000000e+00> : vector<16x128xf32>
    %2 = tpu.matmul %0, %1, %cst {dimension_numbers = #tpu.dot_dimension_numbers<[1], [0], [0], [1], [0, 0, 1, 1], [], []>} : vector<16x112xbf16>, vector<112x128xbf16>, vector<16x128xf32> -> vector<16x128xf32>
    %c0_3 = arith.constant 0 : index
    %c0_4 = arith.constant 0 : index
    %3 = vector.load %arg3[%c0_3, %c0_4] : memref<16x1xf32, #tpu.memory_space<vmem>>, vector<16x1xf32>
    %4 = vector.broadcast %3 : vector<16x1xf32> to vector<16x128xf32>
    %5 = arith.addf %2, %4 : vector<16x128xf32>
    %cst_5 = arith.constant 0.000000e+00 : f32
    %6 = vector.broadcast %cst_5 : f32 to vector<16x128xf32>
    %7 = arith.maximumf %5, %6 : vector<16x128xf32>
    %c0_6 = arith.constant 0 : index
    %c0_7 = arith.constant 0 : index
    %8 = vector.load %arg4[%c0_6, %c0_7] : memref<8x16xbf16, #tpu.memory_space<vmem>>, vector<8x16xbf16>
    %9 = arith.truncf %7 : vector<16x128xf32> to vector<16x128xbf16>
    %cst_8 = arith.constant dense<0.000000e+00> : vector<8x128xf32>
    %10 = tpu.matmul %8, %9, %cst_8 {dimension_numbers = #tpu.dot_dimension_numbers<[1], [0], [0], [1], [0, 0, 1, 1], [], []>} : vector<8x16xbf16>, vector<16x128xbf16>, vector<8x128xf32> -> vector<8x128xf32>
    %c0_9 = arith.constant 0 : index
    %c0_10 = arith.constant 0 : index
    %11 = vector.load %arg5[%c0_9, %c0_10] : memref<8x1xf32, #tpu.memory_space<vmem>>, vector<8x1xf32>
    %12 = vector.broadcast %11 : vector<8x1xf32> to vector<8x128xf32>
    %13 = arith.addf %10, %12 : vector<8x128xf32>
    %cst_11 = arith.constant 0.000000e+00 : f32
    %14 = vector.broadcast %cst_11 : f32 to vector<8x128xf32>
    %15 = arith.maximumf %13, %14 : vector<8x128xf32>
    %c0_12 = arith.constant 0 : index
    %c0_13 = arith.constant 0 : index
    %16 = vector.load %arg6[%c0_12, %c0_13] : memref<8x128xf32, #tpu.memory_space<vmem>>, vector<8x128xf32>
    tpu.vector_store %arg6[%c0_12, %c0_13], %15 {strides = array<i32>} : memref<8x128xf32, #tpu.memory_space<vmem>>, vector<8x128xf32>,
    return
  }
  func.func @transform_0(%arg0: i32) -> (i32, i32) {
    %c0_i32 = arith.constant 0 : i32
    %c0_i32_0 = arith.constant 0 : i32
    return %c0_i32, %arg0 : i32, i32
  }
  func.func @transform_1(%arg0: i32) -> (i32, i32) {
    %c0_i32 = arith.constant 0 : i32
    %c0_i32_0 = arith.constant 0 : i32
    %c0_i32_1 = arith.constant 0 : i32
    return %c0_i32, %c0_i32_0 : i32, i32
  }
  func.func @transform_2(%arg0: i32) -> (i32, i32) {
    %c0_i32 = arith.constant 0 : i32
    %c0_i32_0 = arith.constant 0 : i32
    %c0_i32_1 = arith.constant 0 : i32
    return %c0_i32, %c0_i32_0 : i32, i32
  }
  func.func @transform_3(%arg0: i32) -> (i32, i32) {
    %c0_i32 = arith.constant 0 : i32
    %c0_i32_0 = arith.constant 0 : i32
    %c0_i32_1 = arith.constant 0 : i32
    return %c0_i32, %c0_i32_0 : i32, i32
  }
  func.func @transform_4(%arg0: i32) -> (i32, i32) {
    %c0_i32 = arith.constant 0 : i32
    %c0_i32_0 = arith.constant 0 : i32
    %c0_i32_1 = arith.constant 0 : i32
    return %c0_i32, %c0_i32_0 : i32, i32
  }
  func.func @transform_5(%arg0: i32) -> (i32, i32) {
    %c0_i32 = arith.constant 0 : i32
    %c0_i32_0 = arith.constant 0 : i32
    return %c0_i32, %arg0 : i32, i32
  }
}

module attributes {stable_mosaic.version = 11 : i64} {
  func.func @_aspp_fused_kernel(%arg0: i32, %arg1: memref<216x128xbf16, #tpu.memory_space<vmem>>, %arg2: memref<16x216xbf16, #tpu.memory_space<vmem>>, %arg3: memref<16x1xf32, #tpu.memory_space<vmem>>, %arg4: memref<8x16xbf16, #tpu.memory_space<vmem>>, %arg5: memref<8x1xf32, #tpu.memory_space<vmem>>, %arg6: memref<8x128xf32, #tpu.memory_space<vmem>>) attributes {dimension_semantics = [#tpu.dimension_semantics<parallel>], iteration_bounds = array<i64: 1>, scalar_prefetch = 0 : i64, scratch_operands = 0 : i64, tpu.core_type = #tpu.core_type<tc>, window_params = [{transform_indices = @transform_0, window_bounds = array<i64: 216, 128>}, {pipeline_mode = #tpu.pipeline_mode<synchronous>, transform_indices = @transform_1, window_bounds = array<i64: 16, 216>}, {pipeline_mode = #tpu.pipeline_mode<synchronous>, transform_indices = @transform_2, window_bounds = array<i64: 16, 1>}, {pipeline_mode = #tpu.pipeline_mode<synchronous>, transform_indices = @transform_3, window_bounds = array<i64: 8, 16>}, {pipeline_mode = #tpu.pipeline_mode<synchronous>, transform_indices = @transform_4, window_bounds = array<i64: 8, 1>}, {transform_indices = @transform_5, window_bounds = array<i64: 8, 128>}]} {
    %c0 = arith.constant 0 : index
    %c0_0 = arith.constant 0 : index
    %0 = vector.load %arg2[%c0, %c0_0] : memref<16x216xbf16, #tpu.memory_space<vmem>>, vector<16x216xbf16>
    %c0_1 = arith.constant 0 : index
    %c0_2 = arith.constant 0 : index
    %1 = vector.load %arg1[%c0_1, %c0_2] : memref<216x128xbf16, #tpu.memory_space<vmem>>, vector<216x128xbf16>
    %cst = arith.constant dense<0.000000e+00> : vector<16x128xf32>
    %2 = tpu.matmul %0, %1, %cst {dimension_numbers = #tpu.dot_dimension_numbers<[1], [0], [0], [1], [0, 0, 1, 1], [], []>} : vector<16x216xbf16>, vector<216x128xbf16>, vector<16x128xf32> -> vector<16x128xf32>
    %c0_3 = arith.constant 0 : index
    %c0_4 = arith.constant 0 : index
    %3 = vector.load %arg3[%c0_3, %c0_4] : memref<16x1xf32, #tpu.memory_space<vmem>>, vector<16x1xf32>
    %4 = vector.broadcast %3 : vector<16x1xf32> to vector<16x128xf32>
    %5 = arith.addf %2, %4 : vector<16x128xf32>
    %cst_5 = arith.constant 0.000000e+00 : f32
    %6 = vector.broadcast %cst_5 : f32 to vector<16x128xf32>
    %7 = arith.maximumf %5, %6 : vector<16x128xf32>
    %c0_6 = arith.constant 0 : index
    %c0_7 = arith.constant 0 : index
    %8 = vector.load %arg4[%c0_6, %c0_7] : memref<8x16xbf16, #tpu.memory_space<vmem>>, vector<8x16xbf16>
    %9 = arith.truncf %7 : vector<16x128xf32> to vector<16x128xbf16>
    %cst_8 = arith.constant dense<0.000000e+00> : vector<8x128xf32>
    %10 = tpu.matmul %8, %9, %cst_8 {dimension_numbers = #tpu.dot_dimension_numbers<[1], [0], [0], [1], [0, 0, 1, 1], [], []>} : vector<8x16xbf16>, vector<16x128xbf16>, vector<8x128xf32> -> vector<8x128xf32>
    %c0_9 = arith.constant 0 : index
    %c0_10 = arith.constant 0 : index
    %11 = vector.load %arg5[%c0_9, %c0_10] : memref<8x1xf32, #tpu.memory_space<vmem>>, vector<8x1xf32>
    %12 = vector.broadcast %11 : vector<8x1xf32> to vector<8x128xf32>
    %13 = arith.addf %10, %12 : vector<8x128xf32>
    %cst_11 = arith.constant 0.000000e+00 : f32
    %14 = vector.broadcast %cst_11 : f32 to vector<8x128xf32>
    %15 = arith.maximumf %13, %14 : vector<8x128xf32>
    %c0_12 = arith.constant 0 : index
    %c0_13 = arith.constant 0 : index
    %16 = vector.load %arg6[%c0_12, %c0_13] : memref<8x128xf32, #tpu.memory_space<vmem>>, vector<8x128xf32>
    tpu.vector_store %arg6[%c0_12, %c0_13], %15 {strides = array<i32>} : memref<8x128xf32, #tpu.memory_space<vmem>>, vector<8x128xf32>,
    return
  }
  func.func @transform_0(%arg0: i32) -> (i32, i32) {
    %c0_i32 = arith.constant 0 : i32
    %c0_i32_0 = arith.constant 0 : i32
    return %c0_i32, %arg0 : i32, i32
  }
  func.func @transform_1(%arg0: i32) -> (i32, i32) {
    %c0_i32 = arith.constant 0 : i32
    %c0_i32_0 = arith.constant 0 : i32
    %c0_i32_1 = arith.constant 0 : i32
    return %c0_i32, %c0_i32_0 : i32, i32
  }
  func.func @transform_2(%arg0: i32) -> (i32, i32) {
    %c0_i32 = arith.constant 0 : i32
    %c0_i32_0 = arith.constant 0 : i32
    %c0_i32_1 = arith.constant 0 : i32
    return %c0_i32, %c0_i32_0 : i32, i32
  }
  func.func @transform_3(%arg0: i32) -> (i32, i32) {
    %c0_i32 = arith.constant 0 : i32
    %c0_i32_0 = arith.constant 0 : i32
    %c0_i32_1 = arith.constant 0 : i32
    return %c0_i32, %c0_i32_0 : i32, i32
  }
  func.func @transform_4(%arg0: i32) -> (i32, i32) {
    %c0_i32 = arith.constant 0 : i32
    %c0_i32_0 = arith.constant 0 : i32
    %c0_i32_1 = arith.constant 0 : i32
    return %c0_i32, %c0_i32_0 : i32, i32
  }
  func.func @transform_5(%arg0: i32) -> (i32, i32) {
    %c0_i32 = arith.constant 0 : i32
    %c0_i32_0 = arith.constant 0 : i32
    return %c0_i32, %arg0 : i32, i32
  }
}

</mosaic_0001>

<bundles_post_ra>
// kernel: double_aspp_forward.2
= control target key start
LH: loop header
LB: loop body
LE: loop exit
PB: predicated region body
PF: predicated region fallthrough
CT: control target
= control target key end

     0   :  { %v258_v0 = vmov 0.0   ;;  %vm259_vm0 = vmmov 0   ;;  %v260_v2 = vmov 0   ;;  %vm96_vm1 = vcmask 916480   ;;  %s330_s0 = inlined_call_operand.vmem [shape: bf16[112,128], index: 0, kind: input, shape index: {}]   ;;  %s331_s2 = inlined_call_operand.vmem [shape: f32[16,1], index: 2, kind: input, shape index: {}]   ;;  %s332_s1 = inlined_call_operand.vmem [shape: bf16[16,112], index: 1, kind: input, shape index: {}]   ;;  %s333_s4 = inlined_call_operand.vmem [shape: f32[8,1], index: 4, kind: input, shape index: {}]   ;;  %s334_s3 = inlined_call_operand.vmem [shape: bf16[8,16], index: 3, kind: input, shape index: {}]   ;;  %s335_s5 = inlined_call_operand.vmem [shape: f32[8,128], index: 5, kind: output, shape index: {}]  }
   0x1   :  { %221 = vmatprep.subr.bf16.mxu0 %v258_v0  ;;  %v250_v1 = vld [vmem:[%s330_s0] sm:$0xff]   ;;  %235 = vmatprep.mubr.msk.bf16.mxu0 %vm259_vm0, %v258_v0  ;;  %v251_v3 = vld [vmem:[%s330_s0 + $0x8] sm:$0xff]   ;;  %v252_v4 = vld [vmem:[%s330_s0 + $0x10] sm:$0xff]   ;;  %vm151_vm2 = vcmask 130048  }
   0x2   :  { %248 = vset.pattern.permute.xlu0 %v260_v2  ;;  %239 = vmatprep.subr.bf16.mxu1 %v258_v0  ;;  %v37_v5 = vld [vmem:[%s331_s2] sm:$0xff]  ;;  %v253_v6 = vld [vmem:[%s330_s0 + $0x18] sm:$0xff]   ;;  %v38_v7 = vld [vmem:[%s331_s2 + $0x8] sm:$0xff] }
   0x3   :  { %222 = vmatpush3.bf16.msra.mxu0 %v250_v1  ;;  %241 = vmatprep.mubr.msk.bf16.mxu1 %vm259_vm0, %v258_v0  ;;  %v254_v8 = vld [vmem:[%s330_s0 + $0x20] sm:$0xff]   ;;  %v255_v9 = vld [vmem:[%s330_s0 + $0x28] sm:$0xff]   ;;  %v256_v10 = vld [vmem:[%s330_s0 + $0x30] sm:$0xff]  }
   0x4   :  { %223 = vmatprep.subr.bf16.mxu0 %v258_v0  ;;  %249 = vset.pattern.permute.xlu1 %v260_v2  ;;  %v257_v11 = vld [vmem:[%s332_s1] sm:$0xff]  }
   0x5   :  { %41 = vperm.xlu0 %248, %v37_v5   ;;  %v145_v12 = vld [vmem:[%s333_s4] sm:$0xff] }
   0x6   :  { %148 = vperm.xlu1 %249, %v145_v12   ;;  %v143_v24 = vld [vmem:[%s334_s3] sm:$0xf] }
   0x7   :  { %224 = vmatpush3.bf16.msra.mxu0 %v251_v3 }
   0x8   :  { %225 = vmatprep.subr.bf16.mxu0 %v258_v0 }
   0x9   :  { %46 = vperm.xlu0 %248, %v38_v7  }
   0xb   :  { %226 = vmatpush3.bf16.msra.mxu0 %v252_v4 }
   0xc   :  { %227 = vmatprep.subr.bf16.mxu0 %v258_v0 }
   0xf   :  { %228 = vmatpush3.bf16.msra.mxu0 %v253_v6 }
  0x10   :  { %229 = vmatprep.subr.bf16.mxu0 %v258_v0 }
  0x13   :  { %230 = vmatpush3.bf16.msra.mxu0 %v254_v8 }
  0x14   :  { %231 = vmatprep.subr.bf16.mxu0 %v258_v0 }
  0x17   :  { %232 = vmatpush3.bf16.msra.mxu0 %v255_v9 }
  0x18   :  { %233 = vmatprep.subr.bf16.mxu0 %v258_v0 }
  0x1b   :  { %234 = vmatpush3.bf16.msra.mxu0 %v256_v10 }
  0x1e   :  { %236 = vmatmul.mubr.msk.bf16.vlgmr.msra.gmra.mrb[0].mxu0 %vm96_vm1, %v257_v11 }
  0x84   :  { %v42_v13 = vpop.permute.xlu0 %41 }
  0x85   :  { %v149_v25 = vpop.permute.xlu1 %148 }
  0x88   :  { %v47_v17 = vpop.permute.xlu0 %46 }
  0xf1   :  { %v134_v14 = vpop.f32.mrb[0].mxu0 }
  0xf2   :  { %v135_v15 = vadd.f32 %v134_v14, %v42_v13  ;;  %v237_v16 = vpop.f32.mrb[1].mxu0 }
  0xf3   :  { %v137_v18 = vpop.f32.mrb[2].mxu0 }
  0xf4   :  { %v138_v19 = vadd.f32 %v137_v18, %v47_v17  ;;  %v238_v20 = vpop.f32.mrb[3].mxu0  ;;  %v141_v21 = vmax.f32 %v135_v15, 0.0 }
  0xf6   :  { %v142_v22 = vmax.f32 %v138_v19, 0.0 }
  0xf8   :  { %v144_v23 = vpack.c.bf16 %v142_v22, %v141_v21 }
  0xfa   :  { %240 = vmatpush3.bf16.msra.mxu1 %v144_v23 }
  0xfd   :  { %242 = vmatmul.mubr.msk.bf16.vlgmr.msra.gmra.mrb[0].mxu1 %vm151_vm2, %v143_v24 }
 0x1d0   :  { %v189_v26 = vpop.f32.mrb[0].mxu1 }
 0x1d1   :  { %v190_v27 = vadd.f32 %v189_v26, %v149_v25  ;;  %v243_v28 = vpop.f32.mrb[1].mxu1 }
 0x1d2   :  { %v192_v29 = vpop.f32.mrb[2].mxu1 }
 0x1d3   :  { %v195_v30 = vmax.f32 %v190_v27, 0.0  ;;  %v244_v31 = vpop.f32.mrb[3].mxu1 }
 0x1d5   :  { %196 = vst [vmem:[%s335_s5] sm:$0xff] %v195_v30 }

// kernel: double_aspp_forward.3
= control target key start
LH: loop header
LB: loop body
LE: loop exit
PB: predicated region body
PF: predicated region fallthrough
CT: control target
= control target key end

     0   :  { %v309_v0 = vmov 0   ;;  %vm152_vm0 = vcmask 719872   ;;  %vm156_vm1 = vcmask 1043456   ;;  %v310_v20 = vmov 0.0   ;;  %s405_s0 = inlined_call_operand.vmem [shape: bf16[216,128], index: 0, kind: input, shape index: {}]   ;;  %s406_s1 = inlined_call_operand.vmem [shape: bf16[16,216], index: 1, kind: input, shape index: {}]   ;;  %s407_s2 = inlined_call_operand.vmem [shape: f32[16,1], index: 2, kind: input, shape index: {}]   ;;  %s408_s4 = inlined_call_operand.vmem [shape: f32[8,1], index: 4, kind: input, shape index: {}]   ;;  %s409_s3 = inlined_call_operand.vmem [shape: bf16[8,16], index: 3, kind: input, shape index: {}]   ;;  %s410_s5 = inlined_call_operand.vmem [shape: f32[8,128], index: 5, kind: output, shape index: {}]  }
   0x1   :  { %160 = vmatprep.subr.bf16.mxu0 %v309_v0  ;;  %v292_v1 = vld [vmem:[%s405_s0] sm:$0xff]   ;;  %290 = vset.pattern.permute.xlu0 %v309_v0  ;;  %v293_v2 = vld [vmem:[%s405_s0 + $0x8] sm:$0xff]   ;;  %v294_v3 = vld [vmem:[%s405_s0 + $0x10] sm:$0xff]   ;;  %vm311_vm2 = vmmov 0   ;;  %vm211_vm3 = vcmask 130048  }
   0x2   :  { %291 = vset.pattern.permute.xlu1 %v309_v0  ;;  %161 = vmatpush1.bf16.msra.mxu0 %v292_v1  ;;  %v295_v4 = vld [vmem:[%s405_s0 + $0x18] sm:$0xff]   ;;  %v296_v5 = vld [vmem:[%s405_s0 + $0x20] sm:$0xff]   ;;  %v51_v8 = vld [vmem:[%s407_s2 + $0x8] sm:$0xff] }
   0x3   :  { %162 = vmatprep.subr.bf16.mxu0 %v309_v0  ;;  %v308_v6 = vld [vmem:[%s406_s1 + $0x4] ss:$8 sps:$4 sm:$0xff]   ;;  %v298_v10 = vld [vmem:[%s405_s0 + $0x30] sm:$0xff]   ;;  %v299_v11 = vld [vmem:[%s405_s0 + $0x38] sm:$0xff]   ;;  %281 = vmatprep.subr.bf16.mxu1 %v310_v20 }
   0x4   :  { %v50_v7 = vld [vmem:[%s407_s2] sm:$0xff]  ;;  %277 = vmatprep.mubr.msk.bf16.mxu0 %vm152_vm0, %v308_v6  ;;  %v297_v9 = vld [vmem:[%s405_s0 + $0x28] sm:$0xff]   ;;  %v302_v14 = vld [vmem:[%s405_s0 + $0x50] sm:$0xff]   ;;  %283 = vmatprep.mubr.msk.bf16.mxu1 %vm311_vm2, %v310_v20 }
   0x5   :  { %54 = vperm.xlu0 %290, %v50_v7   ;;  %v300_v12 = vld [vmem:[%s405_s0 + $0x40] sm:$0xff]   ;;  %v301_v13 = vld [vmem:[%s405_s0 + $0x48] sm:$0xff]   ;;  %v303_v15 = vld [vmem:[%s405_s0 + $0x58] sm:$0xff]  }
   0x6   :  { %163 = vmatpush1.bf16.msra.mxu0 %v293_v2  ;;  %v304_v16 = vld [vmem:[%s405_s0 + $0x60] sm:$0xff]   ;;  %v305_v17 = vld [vmem:[%s405_s0 + $0x68] ss:$0 sps:$4 sm:$0xff]  }
   0x7   :  { %164 = vmatprep.subr.bf16.mxu0 %v309_v0  ;;  %v158_v18 = vsel %vm156_vm1, %v305_v17, 0  ;;  %v306_v19 = vld [vmem:[%s406_s1] ss:$8 sps:$4 sm:$0xff]  }
   0x8   :  { %v205_v21 = vld [vmem:[%s408_s4] sm:$0xff] }
   0x9   :  { %59 = vperm.xlu0 %290, %v51_v8   ;;  %208 = vperm.xlu1 %291, %v205_v21   ;;  %v203_v33 = vld [vmem:[%s409_s3] sm:$0xf] }
   0xa   :  { %165 = vmatpush1.bf16.msra.mxu0 %v294_v3 }
   0xb   :  { %166 = vmatprep.subr.bf16.mxu0 %v309_v0 }
   0xe   :  { %167 = vmatpush1.bf16.msra.mxu0 %v295_v4 }
   0xf   :  { %168 = vmatprep.subr.bf16.mxu0 %v309_v0 }
  0x12   :  { %169 = vmatpush1.bf16.msra.mxu0 %v296_v5 }
  0x13   :  { %170 = vmatprep.subr.bf16.mxu0 %v309_v0 }
  0x16   :  { %171 = vmatpush1.bf16.msra.mxu0 %v297_v9 }
  0x17   :  { %172 = vmatprep.subr.bf16.mxu0 %v309_v0 }
  0x1a   :  { %173 = vmatpush1.bf16.msra.mxu0 %v298_v10 }
  0x1b   :  { %174 = vmatprep.subr.bf16.mxu0 %v309_v0 }
  0x1e   :  { %175 = vmatpush1.bf16.msra.mxu0 %v299_v11 }
  0x1f   :  { %176 = vmatprep.subr.bf16.mxu0 %v309_v0 }
  0x22   :  { %177 = vmatpush1.bf16.msra.mxu0 %v300_v12 }
  0x23   :  { %178 = vmatprep.subr.bf16.mxu0 %v309_v0 }
  0x26   :  { %179 = vmatpush1.bf16.msra.mxu0 %v301_v13 }
  0x27   :  { %180 = vmatprep.subr.bf16.mxu0 %v309_v0 }
  0x2a   :  { %181 = vmatpush1.bf16.msra.mxu0 %v302_v14 }
  0x2b   :  { %182 = vmatprep.subr.bf16.mxu0 %v309_v0 }
  0x2e   :  { %183 = vmatpush1.bf16.msra.mxu0 %v303_v15 }
  0x2f   :  { %184 = vmatprep.subr.bf16.mxu0 %v309_v0 }
  0x32   :  { %185 = vmatpush1.bf16.msra.mxu0 %v304_v16 }
  0x33   :  { %186 = vmatprep.subr.bf16.mxu0 %v309_v0 }
  0x36   :  { %187 = vmatpush1.bf16.msra.mxu0 %v158_v18 }
  0x39   :  { %193 = vmatmul.mubr.bf16.vlgmr.msra.gmra.mrb[0].mxu0 %v306_v19 }
  0x84   :  { %v55_v22 = vpop.permute.xlu0 %54 }
  0x88   :  { %v60_v26 = vpop.permute.xlu0 %59  ;;  %v209_v34 = vpop.permute.xlu1 %208 }
 0x10c   :  { %v194_v23 = vpop.f32.mrb[0].mxu0 }
 0x10d   :  { %v195_v24 = vadd.f32 %v194_v23, %v55_v22  ;;  %v196_v25 = vpop.f32.mrb[1].mxu0 }
 0x10e   :  { %v197_v27 = vpop.f32.mrb[2].mxu0 }
 0x10f   :  { %v198_v28 = vadd.f32 %v197_v27, %v60_v26  ;;  %v199_v29 = vpop.f32.mrb[3].mxu0  ;;  %v201_v30 = vmax.f32 %v195_v24, 0.0 }
 0x111   :  { %v202_v31 = vmax.f32 %v198_v28, 0.0 }
 0x113   :  { %v204_v32 = vpack.c.bf16 %v202_v31, %v201_v30 }
 0x115   :  { %282 = vmatpush3.bf16.msra.mxu1 %v204_v32 }
 0x118   :  { %284 = vmatmul.mubr.msk.bf16.vlgmr.msra.gmra.mrb[0].mxu1 %vm211_vm3, %v203_v33 }
 0x1eb   :  { %v249_v35 = vpop.f32.mrb[0].mxu1 }
 0x1ec   :  { %v250_v36 = vadd.f32 %v249_v35, %v209_v34  ;;  %v285_v37 = vpop.f32.mrb[1].mxu1 }
 0x1ed   :  { %v252_v38 = vpop.f32.mrb[2].mxu1 }
 0x1ee   :  { %v255_v39 = vmax.f32 %v250_v36, 0.0  ;;  %v286_v40 = vpop.f32.mrb[3].mxu1 }
 0x1f0   :  { %256 = vst [vmem:[%s410_s5] sm:$0xff] %v255_v39 }

</bundles_post_ra>
